<compile_context>
chip_gen: v7x
topology: tpu7x:2x2x1
jax: 0.10.0
libtpu: 0.0.40
codegen_flags: <defaults>
</compile_context>

<pallas_src>
import functools

import jax
import jax.numpy as jnp
from jax.experimental import pallas as pl
from jax.experimental.pallas import tpu as pltpu

LANE = 128            # lane (last-dim) width of a vreg
MAX_TILE_M = 8192     # rows per input block: 8192*128*4B = 4 MiB f32
ACC_ROWS_MAX = 64     # small accumulator: 8 vregs -> 8 parallel add chains


def _l2_kernel(*refs, tile_m, acc_rows, m_valid, g_per, needs_mask, scale,
               weighted):
    if weighted:
        x_ref, y_ref, w_ref, o_ref, acc_ref = refs
    else:
        x_ref, y_ref, o_ref, acc_ref = refs
        w_ref = None

    c = pl.program_id(0)
    j = pl.program_id(1)

    @pl.when(j == 0)
    def _():
        acc_ref[...] = jnp.zeros_like(acc_ref)

    d = (x_ref[...] - y_ref[...]).astype(jnp.float32)
    if weighted:
        d = d * w_ref[...].astype(jnp.float32)
    dd = d * d

    def accumulate(vals):
        # Fold the (tile_m, 128) block into the small (acc_rows, 128)
        # accumulator.  acc_rows % 8 == 0, so the reshape never crosses an
        # (8, 128) tile boundary and the sum is pure VPU vreg adds.
        if tile_m == acc_rows:
            acc_ref[...] += vals
        else:
            acc_ref[...] += vals.reshape(
                tile_m // acc_rows, acc_rows, LANE).sum(axis=0)

    if needs_mask:
        # Only boundary blocks (partial last block, or duplicated clamped
        # blocks read by a second core slice) pay for the row mask; interior
        # blocks stay a pure streaming accumulate.
        blk = c * g_per + j                       # un-clamped block index
        is_edge = (blk + 1) * tile_m > m_valid

        @pl.when(is_edge)
        def _():
            row = jax.lax.broadcasted_iota(jnp.int32, (tile_m, LANE), 0)
            global_row = blk * tile_m + row
            # jnp.where is a *select*: garbage/NaN read from the OOB /
            # duplicated region cannot leak in (do NOT turn this into dd*mask).
            accumulate(jnp.where(global_row < m_valid, dd, jnp.float32(0.0)))

        @pl.when(jnp.logical_not(is_edge))
        def _():
            accumulate(dd)
    else:
        accumulate(dd)

    @pl.when(j == pl.num_programs(1) - 1)
    def _():
        if acc_rows == 8:
            partial = acc_ref[...]
        else:
            partial = acc_ref[...].reshape(acc_rows // 8, 8, LANE).sum(axis=0)
        o_ref[...] = partial * jnp.float32(scale)


def _round_up(a, b):
    return (a + b - 1) // b * b


def _sublane_multiple(dtype):
    # Sub-32-bit dtypes pack along sublanes: (8,128) f32, (16,128) bf16,
    # (32,128) int8/fp8.
    return 8 * max(1, 4 // jnp.dtype(dtype).itemsize)


def _num_tensorcores():
    # The leading "parallel" split only pays off on multi-TensorCore chips
    # (v7x: 2 TCs/chip); on 1-TC v5e/v6e it is pure overhead (duplicated
    # clamped block + mask), so use 1 there.
    try:
        kind = jax.devices()[0].device_kind.lower()
    except Exception:
        return 1
    return 2 if "7" in kind else 1


def l2_loss(x, y, weights=None, *, batch_size, num_split=None):
    """Pallas equivalent of L2Loss.forward.

    x, y: NCHW arrays of identical shape.
    weights: optional NCHW array; its leading dim is sliced to x.shape[0]
             (matching `weights[:x.data.shape[0], :, :, :]` in the module).
    Returns a scalar float32 loss.
    """
    scale = 1.0 / (float(batch_size) * 2.0)
    weighted = weights is not None
    if weighted:
        weights = weights[: x.shape[0], :, :, :]

    n = x.size
    n_main = (n // LANE) * LANE
    tail = n - n_main

    # Lane tail (< 128 elements) when numel % 128 != 0: handled with a tiny
    # plain-JAX sum instead of padding every input (which cost a full extra
    # HBM pass per array).
    # TODO(synk): in the ragged case the prefix slice below may still
    # materialize one copy of the main region; a fully in-kernel lane mask
    # would avoid it but is not worth the complexity for a <128-element tail.
    tail_loss = jnp.float32(0.0)
    if tail > 0:
        xt = x.reshape(-1)[n_main:]
        yt = y.reshape(-1)[n_main:]
        dt = (xt - yt).astype(jnp.float32)
        if weighted:
            dt = dt * weights.reshape(-1)[n_main:].astype(jnp.float32)
        tail_loss = jnp.sum(dt * dt) * jnp.float32(scale)

    if n_main == 0:
        return tail_loss

    def to_rows(a):
        flat = a.reshape(-1)
        if tail > 0:
            flat = flat[:n_main]
        return flat.reshape(-1, LANE)          # free view when numel % 128 == 0

    args = [to_rows(x), to_rows(y)]
    if weighted:
        args.append(to_rows(weights))

    m = n_main // LANE
    sub = max(_sublane_multiple(a.dtype) for a in args)
    tile_m = min(MAX_TILE_M, _round_up(m, sub))
    acc_rows = max(r for r in (ACC_ROWS_MAX, 32, 16, 8) if tile_m % r == 0)

    if num_split is None:
        num_split = _num_tensorcores()
    g_total = pl.cdiv(m, tile_m)                   # row-blocks covering data
    g_per = pl.cdiv(g_total, num_split)            # row-blocks per core slice
    # Mask only when some block is partial or duplicated (static decision).
    needs_mask = (num_split * g_per * tile_m != m)

    def in_map(c, j):
        # Clamp so the DMA never starts past the array; duplicated reads of
        # the clamped block are fully zeroed by the in-kernel mask.
        return (jnp.minimum(c * g_per + j, g_total - 1), 0)

    # TODO(synk): on v7x, if a trace shows the plain "parallel" leading axis
    # is not sharded across the 2 TensorCores, switch it to
    # pltpu.CORE_PARALLEL and optionally add pipeline_mode=pl.Buffered(3)
    # on the input specs.
    in_specs = [pl.BlockSpec((tile_m, LANE), in_map) for _ in args]
    # Lane-dense per-core output rows: core slice c writes rows [8c, 8c+8).
    out_spec = pl.BlockSpec((8, LANE), lambda c, j: (c, 0))
    out_shape = jax.ShapeDtypeStruct((num_split * 8, LANE), jnp.float32)

    kernel = functools.partial(
        _l2_kernel,
        tile_m=tile_m,
        acc_rows=acc_rows,
        m_valid=m,
        g_per=g_per,
        needs_mask=needs_mask,
        scale=scale,
        weighted=weighted,
    )

    # Double-buffered input blocks + small accumulator; raise the scoped VMEM
    # limit so tile_m=8192 also works under v5e's 16 MiB default.
    in_bytes = sum(2 * tile_m * LANE * jnp.dtype(a.dtype).itemsize
                   for a in args)
    vmem_limit = max(in_bytes + (8 << 20), 32 << 20)

    bytes_accessed = sum(int(a.size) * jnp.dtype(a.dtype).itemsize
                         for a in args) + num_split * 8 * LANE * 4
    flops = (4 if weighted else 3) * m * LANE

    partials = pl.pallas_call(
        kernel,
        out_shape=out_shape,
        grid_spec=pltpu.PrefetchScalarGridSpec(
            num_scalar_prefetch=0,
            grid=(num_split, g_per),
            in_specs=in_specs,
            out_specs=out_spec,
            scratch_shapes=[pltpu.VMEM((acc_rows, LANE), jnp.float32)],
        ),
        compiler_params=pltpu.CompilerParams(
            dimension_semantics=("parallel", "arbitrary"),
            vmem_limit_bytes=int(vmem_limit)),
        cost_estimate=pl.CostEstimate(
            flops=int(flops), transcendentals=0,
            bytes_accessed=int(bytes_accessed)),
    )(*args)

    # Tiny final reduction of the (num_split*8, 128) per-core partials.
    return jnp.sum(partials) + tail_loss


def l2_loss_ref(x, y, weights=None, *, batch_size):
    if weights is not None:
        val = (x - y) * weights[: x.shape[0], :, :, :]
    else:
        val = x - y
    return jnp.sum(val.astype(jnp.float32) ** 2) / batch_size / 2.0


if __name__ == "__main__":
    key = jax.random.PRNGKey(0)
    kx, ky, kw = jax.random.split(key, 3)

    batch_size = 2
    x = jax.random.normal(kx, (2, 4, 16, 16), dtype=jnp.float32)
    y = jax.random.normal(ky, (2, 4, 16, 16), dtype=jnp.float32)
    # weights buffer with a larger leading dim to exercise the [:x.shape[0]] slice
    weights = jax.random.normal(kw, (4, 4, 16, 16), dtype=jnp.float32)

    # unweighted
    out_plain = jax.block_until_ready(l2_loss(x, y, batch_size=batch_size))
    ref_plain = l2_loss_ref(x, y, batch_size=batch_size)
    assert jnp.allclose(out_plain, ref_plain, rtol=1e-5, atol=1e-5), (
        out_plain, ref_plain)

    # weighted
    out_w = jax.block_until_ready(
        l2_loss(x, y, weights, batch_size=batch_size))
    ref_w = l2_loss_ref(x, y, weights, batch_size=batch_size)
    assert jnp.allclose(out_w, ref_w, rtol=1e-5, atol=1e-5), (out_w, ref_w)

    # ragged numel (not a multiple of 128): exercises the gated partial-block
    # mask and the wrapper-side lane-tail path (no jnp.pad).
    xr = jax.random.normal(kx, (2, 4, 9, 9), dtype=jnp.float32)
    yr = jax.random.normal(ky, (2, 4, 9, 9), dtype=jnp.float32)
    wr = jax.random.normal(kw, (4, 4, 9, 9), dtype=jnp.float32)
    out_r = jax.block_until_ready(
        l2_loss(xr, yr, wr, batch_size=batch_size))
    ref_r = l2_loss_ref(xr, yr, wr, batch_size=batch_size)
    assert jnp.allclose(out_r, ref_r, rtol=1e-5, atol=1e-5), (out_r, ref_r)

    print("KERNEL_OK")
</pallas_src>

<mosaic_0001>
module attributes {stable_mosaic.version = 11 : i64} {
  func.func @_l2_kernel(%arg0: i32, %arg1: i32, %arg2: memref<16x128xf32, #tpu.memory_space<vmem>>, %arg3: memref<16x128xf32, #tpu.memory_space<vmem>>, %arg4: memref<8x128xf32, #tpu.memory_space<vmem>>, %arg5: memref<16x128xf32, #tpu.memory_space<vmem>>) attributes {dimension_semantics = [#tpu.dimension_semantics<parallel>, #tpu.dimension_semantics<arbitrary>], iteration_bounds = array<i64: 1, 1>, scalar_prefetch = 0 : i64, scratch_operands = 1 : i64, tpu.core_type = #tpu.core_type<tc>, window_params = [{transform_indices = @transform_0, window_bounds = array<i64: 16, 128>}, {transform_indices = @transform_1, window_bounds = array<i64: 16, 128>}, {transform_indices = @transform_2, window_bounds = array<i64: 8, 128>}]} {
    %c0_i32 = arith.constant 0 : i32
    %0 = arith.cmpi eq, %arg1, %c0_i32 : i32
    %1 = arith.extui %0 : i1 to i32
    %c0_i32_0 = arith.constant 0 : i32
    %2 = arith.cmpi ne, %1, %c0_i32_0 : i32
    scf.if %2 {
      %cst = arith.constant 0.000000e+00 : f32
      %13 = vector.broadcast %cst : f32 to vector<16x128xf32>
      %c0_10 = arith.constant 0 : index
      %c0_11 = arith.constant 0 : index
      %14 = vector.load %arg5[%c0_10, %c0_11] : memref<16x128xf32, #tpu.memory_space<vmem>>, vector<16x128xf32>
      tpu.vector_store %arg5[%c0_10, %c0_11], %13 {strides = array<i32>} : memref<16x128xf32, #tpu.memory_space<vmem>>, vector<16x128xf32>,
    } else {
    }
    %c0 = arith.constant 0 : index
    %c0_1 = arith.constant 0 : index
    %3 = vector.load %arg2[%c0, %c0_1] : memref<16x128xf32, #tpu.memory_space<vmem>>, vector<16x128xf32>
    %c0_2 = arith.constant 0 : index
    %c0_3 = arith.constant 0 : index
    %4 = vector.load %arg3[%c0_2, %c0_3] : memref<16x128xf32, #tpu.memory_space<vmem>>, vector<16x128xf32>
    %5 = arith.subf %3, %4 : vector<16x128xf32>
    %6 = arith.mulf %5, %5 : vector<16x128xf32>
    %c0_4 = arith.constant 0 : index
    %c0_5 = arith.constant 0 : index
    %7 = vector.load %arg5[%c0_4, %c0_5] : memref<16x128xf32, #tpu.memory_space<vmem>>, vector<16x128xf32>
    %8 = arith.addf %7, %6 : vector<16x128xf32>
    %c0_6 = arith.constant 0 : index
    %c0_7 = arith.constant 0 : index
    %9 = vector.load %arg5[%c0_6, %c0_7] : memref<16x128xf32, #tpu.memory_space<vmem>>, vector<16x128xf32>
    tpu.vector_store %arg5[%c0_6, %c0_7], %8 {strides = array<i32>} : memref<16x128xf32, #tpu.memory_space<vmem>>, vector<16x128xf32>,
    %c0_i32_8 = arith.constant 0 : i32
    %10 = arith.cmpi eq, %arg1, %c0_i32_8 : i32
    %11 = arith.extui %10 : i1 to i32
    %c0_i32_9 = arith.constant 0 : i32
    %12 = arith.cmpi ne, %11, %c0_i32_9 : i32
    scf.if %12 {
      %c0_10 = arith.constant 0 : index
      %c0_11 = arith.constant 0 : index
      %13 = vector.load %arg5[%c0_10, %c0_11] : memref<16x128xf32, #tpu.memory_space<vmem>>, vector<16x128xf32>
      %14 = vector.shape_cast %13 : vector<16x128xf32> to vector<2x8x128xf32>
      %cst = arith.constant dense<0.000000e+00> : vector<8x128xf32>
      %15 = vector.multi_reduction <add>, %14, %cst [0] : vector<2x8x128xf32> to vector<8x128xf32>
      %cst_12 = arith.constant 2.500000e-01 : f32
      %16 = vector.broadcast %cst_12 : f32 to vector<8x128xf32>
      %17 = arith.mulf %15, %16 : vector<8x128xf32>
      %c0_13 = arith.constant 0 : index
      %c0_14 = arith.constant 0 : index
      %18 = vector.load %arg4[%c0_13, %c0_14] : memref<8x128xf32, #tpu.memory_space<vmem>>, vector<8x128xf32>
      tpu.vector_store %arg4[%c0_13, %c0_14], %17 {strides = array<i32>} : memref<8x128xf32, #tpu.memory_space<vmem>>, vector<8x128xf32>,
    } else {
    }
    return
  }
  func.func @transform_0(%arg0: i32, %arg1: i32) -> (i32, i32) {
    %c1_i32 = arith.constant 1 : i32
    %0 = arith.muli %arg0, %c1_i32 : i32
    %1 = arith.addi %0, %arg1 : i32
    %c0_i32 = arith.constant 0 : i32
    %2 = arith.minsi %1, %c0_i32 : i32
    %c0_i32_0 = arith.constant 0 : i32
    %c0_i32_1 = arith.constant 0 : i32
    return %2, %c0_i32_0 : i32, i32
  }
  func.func @transform_1(%arg0: i32, %arg1: i32) -> (i32, i32) {
    %c1_i32 = arith.constant 1 : i32
    %0 = arith.muli %arg0, %c1_i32 : i32
    %1 = arith.addi %0, %arg1 : i32
    %c0_i32 = arith.constant 0 : i32
    %2 = arith.minsi %1, %c0_i32 : i32
    %c0_i32_0 = arith.constant 0 : i32
    %c0_i32_1 = arith.constant 0 : i32
    return %2, %c0_i32_0 : i32, i32
  }
  func.func @transform_2(%arg0: i32, %arg1: i32) -> (i32, i32) {
    %c0_i32 = arith.constant 0 : i32
    %c0_i32_0 = arith.constant 0 : i32
    return %arg0, %c0_i32 : i32, i32
  }
}

</mosaic_0001>

<bundles_post_ra>
// kernel: tpu_custom_call.1
= control target key start
LH: loop header
LB: loop body
LE: loop exit
PB: predicated region body
PF: predicated region fallthrough
CT: control target
= control target key end

     0   :  { %7 = vsyncpa [#allocation4], 0  ;;  %s241_s0 = inlined_call_operand.hbm [shape: f32[16,128], index: 0, kind: input, shape index: {}]   ;;  %s242_s1 = inlined_call_operand.hbm [shape: f32[16,128], index: 1, kind: input, shape index: {}]   ;;  %s243_s2 = inlined_call_operand.hbm [shape: f32[8,128], index: 2, kind: output, shape index: {}]  }
   0x1   :  { %8 = vsyncpa [#allocation7], 0 }
   0x2   :  { %9 = vsyncpa [#allocation5], 0  ;;  %s185_s9 = smov [#allocation3]   ;;  %s113_s13 = scalar_lea.hbm %s241_s0, 256 }
   0x3   :  { %s21_s10 = sshll.u32 %s185_s9, 4  ;;  %p114_p0 = scmp.ne.s32.totalorder %s241_s0, %s113_s13  ;;  %s22_s10 = int_to_ptr.vmem [resolvable:$true] %s21_s10 }
   0x4   :  { %p117_p1 = scmp.lt.u32.totalorder %s113_s13, %s241_s0 }
   0x6   :  { %p119_p2 = pnand %p117_p1, %p114_p0 }
   0x8   :  { %122 = shalt.err (!%p119_p2)
}
   0x9   :  { %s123_s18 = scalar_lea.vmem %s22_s10, 256  ;;  %p128_p4 = scmp.lt.s32.totalorder %s22_s10, %s22_s10 }
   0xa   :  { %p124_p3 = scmp.ne.s32.totalorder %s22_s10, %s123_s18  ;;  %p129_p5 = scmp.lt.s32.totalorder %s123_s18, %s123_s18 }
   0xc   :  { %p130_p6 = por %p129_p5, %p128_p4 }
   0xe   :  { %p131_p7 = pnand %p130_p6, %p124_p3 }
  0x10   :  { %134 = shalt.err (!%p131_p7)
}
  0x11   :  { %s186_s19 = smov 128   ;;  %s187_s20 = smov 8  }
  0x12   :  { %27 = dma.hbm_to_vmem [thread:$0]  %s241_s0, 256, %s22_s10, [#allocation4], %s186_s19, %s186_s19, %s187_s20  }
  0x13   :  { %s188_s23 = smov [#allocation6]   ;;  %s135_s27 = scalar_lea.hbm %s242_s1, 256 }
  0x14   :  { %s39_s24 = sshll.u32 %s188_s23, 4  ;;  %p136_p8 = scmp.ne.s32.totalorder %s242_s1, %s135_s27  ;;  %s40_s24 = int_to_ptr.vmem [resolvable:$true] %s39_s24 }
  0x15   :  { %p139_p9 = scmp.lt.u32.totalorder %s135_s27, %s242_s1 }
  0x17   :  { %p141_p10 = pnand %p139_p9, %p136_p8 }
  0x19   :  { %144 = shalt.err (!%p141_p10)
}
  0x1a   :  { %s145_s4 = scalar_lea.vmem %s40_s24, 256  ;;  %p150_p12 = scmp.lt.s32.totalorder %s40_s24, %s40_s24 }
  0x1b   :  { %p146_p11 = scmp.ne.s32.totalorder %s40_s24, %s145_s4  ;;  %p151_p13 = scmp.lt.s32.totalorder %s145_s4, %s145_s4 }
  0x1d   :  { %p152_p0 = por %p151_p13, %p150_p12 }
  0x1f   :  { %p153_p1 = pnand %p152_p0, %p146_p11 }
  0x21   :  { %156 = shalt.err (!%p153_p1)
}
  0x22   :  { %45 = dma.hbm_to_vmem [thread:$0]  %s242_s1, 256, %s40_s24, [#allocation7], %s186_s19, %s186_s19, %s187_s20  }
  0x23   :  { %179 = dma.done.wait [#allocation4], 256  }
  0x24   :  { %180 = vsyncadd [#allocation4], 4294967040 }
  0x25   :  { %181 = dma.done.wait [#allocation7], 256  }
  0x26   :  { %182 = vsyncadd [#allocation7], 4294967040  ;;  %v66_v0 = vld [vmem:[#allocation3] sm:$0xff]  ;;  %v67_v1 = vld [vmem:[#allocation3 + $0x8] sm:$0xff]  ;;  %s189_s6 = smov [#allocation8]  }
  0x27   :  { %v68_v2 = vld [vmem:[#allocation6] sm:$0xff]  ;;  %v69_v3 = vld [vmem:[#allocation6 + $0x8] sm:$0xff]  ;;  %s94_s7 = sshll.u32 %s189_s6, 4  ;;  %s95_s7 = int_to_ptr.vmem [resolvable:$true] %s94_s7 }
  0x28   :  { %v70_v4 = vsub.f32 %v66_v0, %v68_v2  ;;  %v71_v5 = vsub.f32 %v67_v1, %v69_v3  ;;  %s157_s8 = scalar_lea.vmem %s95_s7, 128  ;;  %p162_p3 = scmp.lt.s32.totalorder %s95_s7, %s95_s7 }
  0x29   :  { %p158_p2 = scmp.ne.s32.totalorder %s95_s7, %s157_s8  ;;  %p163_p4 = scmp.lt.s32.totalorder %s157_s8, %s157_s8 }
  0x2a   :  { %v72_v6 = vmul.f32 %v70_v4, %v70_v4  ;;  %v73_v7 = vmul.f32 %v71_v5, %v71_v5 }
  0x2b   :  { %p164_p5 = por %p163_p4, %p162_p3 }
  0x2c   :  { %v85_v8 = vadd.f32 %v73_v7, %v72_v6 }
  0x2d   :  { %p165_p6 = pnand %p164_p5, %p158_p2 }
  0x2e   :  { %v86_v9 = vmul.f32 0.25, %v85_v8 }
  0x30   :  { %87 = vst [vmem:[#allocation8] sm:$0xff] %v86_v9 }
  0x31   :  { %168 = shalt.err (!%p165_p6)
}
  0x32   :  { %s169_s10 = scalar_lea.hbm %s243_s2, 128 }
  0x33   :  { %p170_p7 = scmp.ne.s32.totalorder %s243_s2, %s169_s10  ;;  %p173_p8 = scmp.lt.u32.totalorder %s169_s10, %s243_s2 }
  0x35   :  { %p175_p9 = pnand %p173_p8, %p170_p7 }
  0x37   :  { %178 = shalt.err (!%p175_p9)
}
  0x38   :  { %97 = dma.vmem_to_hbm [thread:$0]  %s95_s7, 128, %s243_s2, [#allocation5]  }
  0x39   :  { %183 = dma.done.wait [#allocation5], 128  }
  0x3a   :  { %184 = vsyncadd [#allocation5], 4294967168 }
  0x3b   :  { %101 = vsyncpa [#allocation4], 1 }
  0x3c   :  { %102 = vsyncpa [#allocation7], 1 }
  0x3d   :  { %103 = vsyncpa [#allocation5], 1 }

</bundles_post_ra>
